<compile_context>
chip_gen: v5e
topology: v5e:2x2
jax: 0.10.0
libtpu: 0.0.40
codegen_flags: <defaults>
</compile_context>

<pallas_src>
import jax
import jax.numpy as jnp
from jax.experimental import pallas as pl
from jax.experimental.pallas import tpu as pltpu

# Hodgkin–Huxley constants from the PyTorch module.
THRESH = 2.0
V_NA, V_K, V_L, V_CA = 115.0, -12.0, 10.6, 120.0
GBAR_NA, GBAR_K, GBAR_L, GBAR_CA = 120.0, 36.0, 0.3, 0.1
ALPHA_CA, BETA_CA = 0.055, 0.94
ALPHA_HCA, BETA_HCA = 0.000457, 0.0065

ROWS = 8          # packed batch rows per register-resident chunk (one f32 vreg row-group)
MAX_TILE = 512    # max packed batch rows per grid step


def hh_qnet_kernel(x_ref, w_ref, b_ref, coe_ref, wout_ref, bout_ref, out_ref, u_ref):
    """Fused twin-head HH Q-network forward for one (packed) batch tile.

    x_ref    : [wins, bt, F]   time-major inputs; F = pack*(ni+na)
    w_ref    : [F, L]          block-diag fc weight (x @ W); L = pack*2H (heads on lanes)
    b_ref    : [1, L]          fc bias
    coe_ref  : [7, L]          rows = (dt, a_n, b_n, a_m, b_m, a_h, b_h)
    wout_ref : [L, pack*2]     block-diag output weights, pre-scaled by 1/wins
    bout_ref : [1, pack*2]     output biases
    out_ref  : [bt, pack*2]    packed (Q1, Q2) per packed batch row
    u_ref    : [wins*bt, L]    VMEM scratch: projected inputs for every timestep
    """
    wins, bt, f = x_ref.shape
    lanes = w_ref.shape[1]

    # fc projection: ONE MXU dot for every timestep of the tile.  Time-major => the
    # per-step row block of u_ref is contiguous (no strided slicing inside the loop).
    x_all = x_ref[...].reshape(wins * bt, f)
    u_ref[...] = (jnp.dot(x_all, w_ref[...], preferred_element_type=jnp.float32)
                  + b_ref[...])

    # Loop-invariant HH coefficients, pre-folded:  gate <- gate*ga + gb.
    # Kept at one vreg row-group [ROWS, lanes]; NEVER materialised at [bt, lanes].
    dt = coe_ref[0:1, :]
    a_n, b_n = coe_ref[1:2, :], coe_ref[2:3, :]
    a_m, b_m = coe_ref[3:4, :], coe_ref[4:5, :]
    a_h, b_h = coe_ref[5:6, :], coe_ref[6:7, :]

    def bc(row):
        return jnp.broadcast_to(row, (ROWS, lanes))

    dt_b = bc(dt)
    ga_n, gb_n = bc(1.0 - (a_n + b_n) * dt), bc(a_n * dt)
    ga_m, gb_m = bc(1.0 - (a_m + b_m) * dt), bc(a_m * dt)
    ga_h, gb_h = bc(1.0 - (a_h + b_h) * dt), bc(a_h * dt)
    ga_ca, gb_ca = bc(1.0 - (ALPHA_CA + BETA_CA) * dt), bc(ALPHA_CA * dt)
    ga_hca, gb_hca = bc(1.0 - (ALPHA_HCA + BETA_HCA) * dt), bc(ALPHA_HCA * dt)

    n_chunks = bt // ROWS

    # HH recurrence over ROWS-row chunks: all 7 state arrays are [ROWS, lanes] (one vreg
    # each), so the fully unrolled time loop stays register-resident instead of spilling.
    @pl.loop(0, n_chunks)
    def _(c):
        r0 = pl.multiple_of(c * ROWS, ROWS)
        zeros = jnp.zeros((ROWS, lanes), jnp.float32)       # zeros_state in the reference
        v = y = m = h = m_ca = h_ca = zeros
        spk = zeros
        for s in range(wins):                               # wins is small & static -> unroll
            start = pl.multiple_of(s * bt + c * ROWS, ROWS)
            inp = u_ref[pl.ds(start, ROWS), :]
            g_na = GBAR_NA * h * (m * m * m)
            g_k = GBAR_K * ((y * y) * (y * y))
            g_ca = GBAR_CA * (m_ca * m_ca) * h_ca
            # I_Na + I_K + I_L + I_Ca == g_tot*v - c_tot   (ionic currents folded)
            g_tot = g_na + g_k + g_ca + GBAR_L
            c_tot = g_na * V_NA + g_k * V_K + g_ca * V_CA + (GBAR_L * V_L)
            v = v + (inp - g_tot * v + c_tot) * dt_b
            y = y * ga_n + gb_n
            m = m * ga_m + gb_m
            h = h * ga_h + gb_h
            m_ca = m_ca * ga_ca + gb_ca
            h_ca = h_ca * ga_hca + gb_hca
            # ActFun.forward: strict (new_v - thresh) > 0, computed from the updated v.
            # TODO(synk): the surrogate-gradient backward (|v-thresh| < lens) is training-only.
            spk = spk + (v - THRESH > 0.0).astype(jnp.float32)
        # mean over time is folded into wout (pre-scaled by 1/wins host-side).
        out_ref[pl.ds(r0, ROWS), :] = (
            jnp.dot(spk, wout_ref[...], preferred_element_type=jnp.float32)
            + bout_ref[...])


def _round_up(x, m):
    return ((x + m - 1) // m) * m


def _pick_tile(packed_rows):
    """Packed batch rows per grid step (multiple of ROWS)."""
    if packed_rows <= ROWS:
        return ROWS
    if packed_rows <= 2 * MAX_TILE:
        # Big tiles amortise the ~0.35us/grid-step pipeline overhead, but keep grid >= 2
        # so a v7x megacore can shard the batch axis across both TensorCores.
        return max(ROWS, _round_up((packed_rows + 1) // 2, ROWS))
    return MAX_TILE


def qnetwork_forward(params, state, action, wins=None):
    state = state.astype(jnp.float32)
    action = action.astype(jnp.float32)
    batch, seq, ni = state.shape
    na = action.shape[2]
    if wins is None:
        wins = seq
    pack = params["pack"]                      # batch rows packed per vreg row
    d = ni + na
    lanes = params["w"].shape[1]               # pack * 2H
    ncols = params["wout"].shape[1]            # pack * 2

    # Layout plumbing (wrapper-side, cheap): concat features, pack `pack` batch rows per
    # lane group, go time-major so every per-step slice in the kernel is contiguous.
    x = jnp.concatenate([state[:, :wins, :], action[:, :wins, :]], axis=-1)   # [B, wins, d]
    packed_rows = -(-batch // pack)
    bt = _pick_tile(packed_rows)
    bp = _round_up(packed_rows, bt)
    pad = bp * pack - batch
    if pad:
        x = jnp.pad(x, ((0, pad), (0, 0), (0, 0)))
    x = x.reshape(bp, pack, wins, d).transpose(2, 0, 1, 3).reshape(wins, bp, pack * d)

    wout = params["wout"] * (1.0 / wins)       # fold torch.mean(spikes, dim=1) into the head

    out = pl.pallas_call(
        hh_qnet_kernel,
        out_shape=jax.ShapeDtypeStruct((bp, ncols), jnp.float32),
        grid=(bp // bt,),
        in_specs=[
            pl.BlockSpec((wins, bt, pack * d), lambda i: (0, i, 0)),   # x (batch-tiled)
            pl.BlockSpec((pack * d, lanes), lambda i: (0, 0)),         # fc weight (block-diag)
            pl.BlockSpec((1, lanes), lambda i: (0, 0)),                # fc bias
            pl.BlockSpec((7, lanes), lambda i: (0, 0)),                # HH coefficients
            pl.BlockSpec((lanes, ncols), lambda i: (0, 0)),            # out weight (block-diag)
            pl.BlockSpec((1, ncols), lambda i: (0, 0)),                # out bias
        ],
        out_specs=pl.BlockSpec((bt, ncols), lambda i: (i, 0)),
        scratch_shapes=[pltpu.VMEM((wins * bt, lanes), jnp.float32)],
        compiler_params=pltpu.CompilerParams(dimension_semantics=("parallel",)),
    )(x, params["w"], params["b"], params["coe"], wout, params["bout"])

    out = out.reshape(bp * pack, 2)[:batch]    # unpack lane-packed rows -> [B, 2]
    return out[:, 0:1], out[:, 1:2]


def init_params(key, num_inputs, num_actions, hidden_dim):
    D = num_inputs + num_actions
    H = hidden_dim
    pack = max(1, 128 // (2 * H))              # batch rows packed per vreg row (fills lanes)

    def xavier(k, fan_in, fan_out):
        limit = (6.0 / (fan_in + fan_out)) ** 0.5
        return jax.random.uniform(k, (fan_in, fan_out), jnp.float32, -limit, limit)

    def coe(k):
        ks = jax.random.split(k, 7)
        dt = 0.1 * 2.0 * jax.random.uniform(ks[0], (H,), jnp.float32)       # dt = 0.2*rand
        rows = [dt] + [0.1 * jax.random.uniform(kk, (H,), jnp.float32) for kk in ks[1:]]
        return jnp.stack(rows, axis=0)                                       # [7, H]

    k = jax.random.split(key, 6)
    # Twin heads fused along the hidden (lane) axis.
    w2 = jnp.concatenate([xavier(k[0], D, H), xavier(k[3], D, H)], axis=1)   # [D, 2H]
    coe2 = jnp.concatenate([coe(k[1]), coe(k[4])], axis=1)                   # [7, 2H]
    wo2 = jnp.zeros((2 * H, 2), jnp.float32)
    wo2 = wo2.at[:H, 0:1].set(xavier(k[2], H, 1)).at[H:, 1:2].set(xavier(k[5], H, 1))
    b2 = jnp.zeros((2 * H,), jnp.float32)       # weights_init_: bias = 0
    bo2 = jnp.zeros((2,), jnp.float32)

    # Pack `pack` batch rows per lane group: block-diagonal weights, lane-tiled coefficients.
    lanes = pack * 2 * H
    w = jnp.zeros((pack * D, lanes), jnp.float32)
    wout = jnp.zeros((lanes, pack * 2), jnp.float32)
    for j in range(pack):
        w = w.at[j * D:(j + 1) * D, j * 2 * H:(j + 1) * 2 * H].set(w2)
        wout = wout.at[j * 2 * H:(j + 1) * 2 * H, j * 2:(j + 1) * 2].set(wo2)
    return {
        "pack": pack,
        "w": w,                                  # [pack*D, pack*2H]
        "b": jnp.tile(b2, pack)[None, :],        # [1, pack*2H]
        "coe": jnp.tile(coe2, (1, pack)),        # [7, pack*2H]
        "wout": wout,                            # [pack*2H, pack*2]
        "bout": jnp.tile(bo2, pack)[None, :],    # [1, pack*2]
    }


if __name__ == "__main__":
    B, wins = 2, 8
    num_inputs, num_actions, hidden_dim = 4, 2, 32

    key = jax.random.PRNGKey(0)
    kp, ks, ka = jax.random.split(key, 3)
    params = init_params(kp, num_inputs, num_actions, hidden_dim)
    state = jax.random.normal(ks, (B, wins, num_inputs), jnp.float32)
    action = jax.random.normal(ka, (B, wins, num_actions), jnp.float32)

    fwd = jax.jit(lambda s, a: qnetwork_forward(params, s, a))
    out1, out2 = fwd(state, action)
    jax.block_until_ready((out1, out2))
    assert out1.shape == (B, 1) and out2.shape == (B, 1)
    assert out1.dtype == jnp.float32 and out2.dtype == jnp.float32
    assert bool(jnp.all(jnp.isfinite(out1))) and bool(jnp.all(jnp.isfinite(out2)))
    print("KERNEL_OK")
</pallas_src>

<mosaic_0001>
module attributes {stable_mosaic.version = 11 : i64} {
  func.func @hh_qnet_kernel(%arg0: i32, %arg1: memref<8x8x12xf32, #tpu.memory_space<vmem>>, %arg2: memref<12x128xf32, #tpu.memory_space<vmem>>, %arg3: memref<1x128xf32, #tpu.memory_space<vmem>>, %arg4: memref<7x128xf32, #tpu.memory_space<vmem>>, %arg5: memref<128x4xf32, #tpu.memory_space<vmem>>, %arg6: memref<1x4xf32, #tpu.memory_space<vmem>>, %arg7: memref<8x4xf32, #tpu.memory_space<vmem>>, %arg8: memref<64x128xf32, #tpu.memory_space<vmem>>) attributes {dimension_semantics = [#tpu.dimension_semantics<parallel>], iteration_bounds = array<i64: 1>, scalar_prefetch = 0 : i64, scratch_operands = 1 : i64, tpu.core_type = #tpu.core_type<tc>, window_params = [{transform_indices = @transform_0, window_bounds = array<i64: 8, 8, 12>}, {pipeline_mode = #tpu.pipeline_mode<synchronous>, transform_indices = @transform_1, window_bounds = array<i64: 12, 128>}, {pipeline_mode = #tpu.pipeline_mode<synchronous>, transform_indices = @transform_2, window_bounds = array<i64: 1, 128>}, {pipeline_mode = #tpu.pipeline_mode<synchronous>, transform_indices = @transform_3, window_bounds = array<i64: 7, 128>}, {pipeline_mode = #tpu.pipeline_mode<synchronous>, transform_indices = @transform_4, window_bounds = array<i64: 128, 4>}, {pipeline_mode = #tpu.pipeline_mode<synchronous>, transform_indices = @transform_5, window_bounds = array<i64: 1, 4>}, {transform_indices = @transform_6, window_bounds = array<i64: 8, 4>}]} {
    %c0 = arith.constant 0 : index
    %c0_0 = arith.constant 0 : index
    %c0_1 = arith.constant 0 : index
    %0 = vector.load %arg1[%c0, %c0_0, %c0_1] : memref<8x8x12xf32, #tpu.memory_space<vmem>>, vector<8x8x12xf32>
    %1 = vector.shape_cast %0 : vector<8x8x12xf32> to vector<64x12xf32>
    %c0_2 = arith.constant 0 : index
    %c0_3 = arith.constant 0 : index
    %2 = vector.load %arg2[%c0_2, %c0_3] : memref<12x128xf32, #tpu.memory_space<vmem>>, vector<12x128xf32>
    %cst = arith.constant dense<0.000000e+00> : vector<64x128xf32>
    %3 = tpu.matmul %1, %2, %cst {dimension_numbers = #tpu.dot_dimension_numbers<[1], [0], [0], [1], [0, 0, 1, 1], [], []>} : vector<64x12xf32>, vector<12x128xf32>, vector<64x128xf32> -> vector<64x128xf32>
    %c0_4 = arith.constant 0 : index
    %c0_5 = arith.constant 0 : index
    %4 = vector.load %arg3[%c0_4, %c0_5] : memref<1x128xf32, #tpu.memory_space<vmem>>, vector<1x128xf32>
    %5 = vector.broadcast %4 : vector<1x128xf32> to vector<64x128xf32>
    %6 = arith.addf %3, %5 : vector<64x128xf32>
    %c0_6 = arith.constant 0 : index
    %c0_7 = arith.constant 0 : index
    %7 = vector.load %arg8[%c0_6, %c0_7] : memref<64x128xf32, #tpu.memory_space<vmem>>, vector<64x128xf32>
    tpu.vector_store %arg8[%c0_6, %c0_7], %6 {strides = array<i32>} : memref<64x128xf32, #tpu.memory_space<vmem>>, vector<64x128xf32>,
    %c0_8 = arith.constant 0 : index
    %c0_9 = arith.constant 0 : index
    %8 = vector.load %arg4[%c0_8, %c0_9] : memref<7x128xf32, #tpu.memory_space<vmem>>, vector<1x128xf32>
    %c1 = arith.constant 1 : index
    %c0_10 = arith.constant 0 : index
    %9 = vector.load %arg4[%c1, %c0_10] : memref<7x128xf32, #tpu.memory_space<vmem>>, vector<1x128xf32>
    %c2 = arith.constant 2 : index
    %c0_11 = arith.constant 0 : index
    %10 = vector.load %arg4[%c2, %c0_11] : memref<7x128xf32, #tpu.memory_space<vmem>>, vector<1x128xf32>
    %c3 = arith.constant 3 : index
    %c0_12 = arith.constant 0 : index
    %11 = vector.load %arg4[%c3, %c0_12] : memref<7x128xf32, #tpu.memory_space<vmem>>, vector<1x128xf32>
    %c4 = arith.constant 4 : index
    %c0_13 = arith.constant 0 : index
    %12 = vector.load %arg4[%c4, %c0_13] : memref<7x128xf32, #tpu.memory_space<vmem>>, vector<1x128xf32>
    %c5 = arith.constant 5 : index
    %c0_14 = arith.constant 0 : index
    %13 = vector.load %arg4[%c5, %c0_14] : memref<7x128xf32, #tpu.memory_space<vmem>>, vector<1x128xf32>
    %c6 = arith.constant 6 : index
    %c0_15 = arith.constant 0 : index
    %14 = vector.load %arg4[%c6, %c0_15] : memref<7x128xf32, #tpu.memory_space<vmem>>, vector<1x128xf32>
    %15 = vector.shape_cast %8 : vector<1x128xf32> to vector<1x128xf32>
    %16 = vector.broadcast %15 : vector<1x128xf32> to vector<8x128xf32>
    %17 = arith.addf %9, %10 : vector<1x128xf32>
    %18 = arith.mulf %17, %8 : vector<1x128xf32>
    %cst_16 = arith.constant 1.000000e+00 : f32
    %19 = vector.broadcast %cst_16 : f32 to vector<1x128xf32>
    %20 = arith.subf %19, %18 : vector<1x128xf32>
    %21 = vector.shape_cast %20 : vector<1x128xf32> to vector<1x128xf32>
    %22 = vector.broadcast %21 : vector<1x128xf32> to vector<8x128xf32>
    %23 = arith.mulf %9, %8 : vector<1x128xf32>
    %24 = vector.shape_cast %23 : vector<1x128xf32> to vector<1x128xf32>
    %25 = vector.broadcast %24 : vector<1x128xf32> to vector<8x128xf32>
    %26 = arith.addf %11, %12 : vector<1x128xf32>
    %27 = arith.mulf %26, %8 : vector<1x128xf32>
    %cst_17 = arith.constant 1.000000e+00 : f32
    %28 = vector.broadcast %cst_17 : f32 to vector<1x128xf32>
    %29 = arith.subf %28, %27 : vector<1x128xf32>
    %30 = vector.shape_cast %29 : vector<1x128xf32> to vector<1x128xf32>
    %31 = vector.broadcast %30 : vector<1x128xf32> to vector<8x128xf32>
    %32 = arith.mulf %11, %8 : vector<1x128xf32>
    %33 = vector.shape_cast %32 : vector<1x128xf32> to vector<1x128xf32>
    %34 = vector.broadcast %33 : vector<1x128xf32> to vector<8x128xf32>
    %35 = arith.addf %13, %14 : vector<1x128xf32>
    %36 = arith.mulf %35, %8 : vector<1x128xf32>
    %cst_18 = arith.constant 1.000000e+00 : f32
    %37 = vector.broadcast %cst_18 : f32 to vector<1x128xf32>
    %38 = arith.subf %37, %36 : vector<1x128xf32>
    %39 = vector.shape_cast %38 : vector<1x128xf32> to vector<1x128xf32>
    %40 = vector.broadcast %39 : vector<1x128xf32> to vector<8x128xf32>
    %41 = arith.mulf %13, %8 : vector<1x128xf32>
    %42 = vector.shape_cast %41 : vector<1x128xf32> to vector<1x128xf32>
    %43 = vector.broadcast %42 : vector<1x128xf32> to vector<8x128xf32>
    %cst_19 = arith.constant 9.950000e-01 : f32
    %44 = vector.broadcast %cst_19 : f32 to vector<1x128xf32>
    %45 = arith.mulf %44, %8 : vector<1x128xf32>
    %cst_20 = arith.constant 1.000000e+00 : f32
    %46 = vector.broadcast %cst_20 : f32 to vector<1x128xf32>
    %47 = arith.subf %46, %45 : vector<1x128xf32>
    %48 = vector.shape_cast %47 : vector<1x128xf32> to vector<1x128xf32>
    %49 = vector.broadcast %48 : vector<1x128xf32> to vector<8x128xf32>
    %cst_21 = arith.constant 5.500000e-02 : f32
    %50 = vector.broadcast %cst_21 : f32 to vector<1x128xf32>
    %51 = arith.mulf %50, %8 : vector<1x128xf32>
    %52 = vector.shape_cast %51 : vector<1x128xf32> to vector<1x128xf32>
    %53 = vector.broadcast %52 : vector<1x128xf32> to vector<8x128xf32>
    %cst_22 = arith.constant 6.957000e-03 : f32
    %54 = vector.broadcast %cst_22 : f32 to vector<1x128xf32>
    %55 = arith.mulf %54, %8 : vector<1x128xf32>
    %cst_23 = arith.constant 1.000000e+00 : f32
    %56 = vector.broadcast %cst_23 : f32 to vector<1x128xf32>
    %57 = arith.subf %56, %55 : vector<1x128xf32>
    %58 = vector.shape_cast %57 : vector<1x128xf32> to vector<1x128xf32>
    %59 = vector.broadcast %58 : vector<1x128xf32> to vector<8x128xf32>
    %cst_24 = arith.constant 4.570000e-04 : f32
    %60 = vector.broadcast %cst_24 : f32 to vector<1x128xf32>
    %61 = arith.mulf %60, %8 : vector<1x128xf32>
    %62 = vector.shape_cast %61 : vector<1x128xf32> to vector<1x128xf32>
    %63 = vector.broadcast %62 : vector<1x128xf32> to vector<8x128xf32>
    %c0_i32 = arith.constant 0 : i32
    %c1_i32 = arith.constant 1 : i32
    %64 = arith.muli %c0_i32, %c1_i32 : i32
    %c0_i32_25 = arith.constant 0 : i32
    %65 = arith.addi %c0_i32_25, %64 : i32
    %c8_i32 = arith.constant 8 : i32
    %66 = arith.muli %65, %c8_i32 : i32
    %67 = tpu.assume_multiple %66, 8 : i32
    %cst_26 = arith.constant 0.000000e+00 : f32
    %68 = vector.broadcast %cst_26 : f32 to vector<8x128xf32>
    %c8_i32_27 = arith.constant 8 : i32
    %69 = arith.muli %65, %c8_i32_27 : i32
    %c0_i32_28 = arith.constant 0 : i32
    %70 = arith.addi %c0_i32_28, %69 : i32
    %71 = tpu.assume_multiple %70, 8 : i32
    %72 = arith.index_cast %71 : i32 to index
    %c0_29 = arith.constant 0 : index
    %73 = vector.load %arg8[%72, %c0_29] : memref<64x128xf32, #tpu.memory_space<vmem>>, vector<8x128xf32>
    %cst_30 = arith.constant 1.200000e+02 : f32
    %74 = vector.broadcast %cst_30 : f32 to vector<8x128xf32>
    %75 = arith.mulf %74, %68 : vector<8x128xf32>
    %76 = arith.mulf %68, %68 : vector<8x128xf32>
    %77 = arith.mulf %76, %68 : vector<8x128xf32>
    %78 = arith.mulf %75, %77 : vector<8x128xf32>
    %79 = arith.mulf %68, %68 : vector<8x128xf32>
    %80 = arith.mulf %68, %68 : vector<8x128xf32>
    %81 = arith.mulf %79, %80 : vector<8x128xf32>
    %cst_31 = arith.constant 3.600000e+01 : f32
    %82 = vector.broadcast %cst_31 : f32 to vector<8x128xf32>
    %83 = arith.mulf %82, %81 : vector<8x128xf32>
    %84 = arith.mulf %68, %68 : vector<8x128xf32>
    %cst_32 = arith.constant 1.000000e-01 : f32
    %85 = vector.broadcast %cst_32 : f32 to vector<8x128xf32>
    %86 = arith.mulf %85, %84 : vector<8x128xf32>
    %87 = arith.mulf %86, %68 : vector<8x128xf32>
    %88 = arith.addf %78, %83 : vector<8x128xf32>
    %89 = arith.addf %88, %87 : vector<8x128xf32>
    %cst_33 = arith.constant 3.000000e-01 : f32
    %90 = vector.broadcast %cst_33 : f32 to vector<8x128xf32>
    %91 = arith.addf %89, %90 : vector<8x128xf32>
    %cst_34 = arith.constant 1.150000e+02 : f32
    %92 = vector.broadcast %cst_34 : f32 to vector<8x128xf32>
    %93 = arith.mulf %78, %92 : vector<8x128xf32>
    %cst_35 = arith.constant -1.200000e+01 : f32
    %94 = vector.broadcast %cst_35 : f32 to vector<8x128xf32>
    %95 = arith.mulf %83, %94 : vector<8x128xf32>
    %96 = arith.addf %93, %95 : vector<8x128xf32>
    %cst_36 = arith.constant 1.200000e+02 : f32
    %97 = vector.broadcast %cst_36 : f32 to vector<8x128xf32>
    %98 = arith.mulf %87, %97 : vector<8x128xf32>
    %99 = arith.addf %96, %98 : vector<8x128xf32>
    %cst_37 = arith.constant 3.180000e+00 : f32
    %100 = vector.broadcast %cst_37 : f32 to vector<8x128xf32>
    %101 = arith.addf %99, %100 : vector<8x128xf32>
    %102 = arith.mulf %91, %68 : vector<8x128xf32>
    %103 = arith.subf %73, %102 : vector<8x128xf32>
    %104 = arith.addf %103, %101 : vector<8x128xf32>
    %105 = arith.mulf %104, %16 : vector<8x128xf32>
    %106 = arith.addf %68, %105 : vector<8x128xf32>
    %107 = arith.mulf %68, %22 : vector<8x128xf32>
    %108 = arith.addf %107, %25 : vector<8x128xf32>
    %109 = arith.mulf %68, %31 : vector<8x128xf32>
    %110 = arith.addf %109, %34 : vector<8x128xf32>
    %111 = arith.mulf %68, %40 : vector<8x128xf32>
    %112 = arith.addf %111, %43 : vector<8x128xf32>
    %113 = arith.mulf %68, %49 : vector<8x128xf32>
    %114 = arith.addf %113, %53 : vector<8x128xf32>
    %115 = arith.mulf %68, %59 : vector<8x128xf32>
    %116 = arith.addf %115, %63 : vector<8x128xf32>
    %cst_38 = arith.constant 2.000000e+00 : f32
    %117 = vector.broadcast %cst_38 : f32 to vector<8x128xf32>
    %118 = arith.subf %106, %117 : vector<8x128xf32>
    %cst_39 = arith.constant 0.000000e+00 : f32
    %119 = vector.broadcast %cst_39 : f32 to vector<8x128xf32>
    %120 = arith.cmpf ogt, %118, %119 : vector<8x128xf32>
    %121 = arith.extui %120 : vector<8x128xi1> to vector<8x128xi32>
    %122 = arith.sitofp %121 : vector<8x128xi32> to vector<8x128xf32>
    %123 = arith.addf %68, %122 : vector<8x128xf32>
    %c8_i32_40 = arith.constant 8 : i32
    %124 = arith.muli %65, %c8_i32_40 : i32
    %c8_i32_41 = arith.constant 8 : i32
    %125 = arith.addi %c8_i32_41, %124 : i32
    %126 = tpu.assume_multiple %125, 8 : i32
    %127 = arith.index_cast %126 : i32 to index
    %c0_42 = arith.constant 0 : index
    %128 = vector.load %arg8[%127, %c0_42] : memref<64x128xf32, #tpu.memory_space<vmem>>, vector<8x128xf32>
    %cst_43 = arith.constant 1.200000e+02 : f32
    %129 = vector.broadcast %cst_43 : f32 to vector<8x128xf32>
    %130 = arith.mulf %129, %112 : vector<8x128xf32>
    %131 = arith.mulf %110, %110 : vector<8x128xf32>
    %132 = arith.mulf %131, %110 : vector<8x128xf32>
    %133 = arith.mulf %130, %132 : vector<8x128xf32>
    %134 = arith.mulf %108, %108 : vector<8x128xf32>
    %135 = arith.mulf %108, %108 : vector<8x128xf32>
    %136 = arith.mulf %134, %135 : vector<8x128xf32>
    %cst_44 = arith.constant 3.600000e+01 : f32
    %137 = vector.broadcast %cst_44 : f32 to vector<8x128xf32>
    %138 = arith.mulf %137, %136 : vector<8x128xf32>
    %139 = arith.mulf %114, %114 : vector<8x128xf32>
    %cst_45 = arith.constant 1.000000e-01 : f32
    %140 = vector.broadcast %cst_45 : f32 to vector<8x128xf32>
    %141 = arith.mulf %140, %139 : vector<8x128xf32>
    %142 = arith.mulf %141, %116 : vector<8x128xf32>
    %143 = arith.addf %133, %138 : vector<8x128xf32>
    %144 = arith.addf %143, %142 : vector<8x128xf32>
    %cst_46 = arith.constant 3.000000e-01 : f32
    %145 = vector.broadcast %cst_46 : f32 to vector<8x128xf32>
    %146 = arith.addf %144, %145 : vector<8x128xf32>
    %cst_47 = arith.constant 1.150000e+02 : f32
    %147 = vector.broadcast %cst_47 : f32 to vector<8x128xf32>
    %148 = arith.mulf %133, %147 : vector<8x128xf32>
    %cst_48 = arith.constant -1.200000e+01 : f32
    %149 = vector.broadcast %cst_48 : f32 to vector<8x128xf32>
    %150 = arith.mulf %138, %149 : vector<8x128xf32>
    %151 = arith.addf %148, %150 : vector<8x128xf32>
    %cst_49 = arith.constant 1.200000e+02 : f32
    %152 = vector.broadcast %cst_49 : f32 to vector<8x128xf32>
    %153 = arith.mulf %142, %152 : vector<8x128xf32>
    %154 = arith.addf %151, %153 : vector<8x128xf32>
    %cst_50 = arith.constant 3.180000e+00 : f32
    %155 = vector.broadcast %cst_50 : f32 to vector<8x128xf32>
    %156 = arith.addf %154, %155 : vector<8x128xf32>
    %157 = arith.mulf %146, %106 : vector<8x128xf32>
    %158 = arith.subf %128, %157 : vector<8x128xf32>
    %159 = arith.addf %158, %156 : vector<8x128xf32>
    %160 = arith.mulf %159, %16 : vector<8x128xf32>
    %161 = arith.addf %106, %160 : vector<8x128xf32>
    %162 = arith.mulf %108, %22 : vector<8x128xf32>
    %163 = arith.addf %162, %25 : vector<8x128xf32>
    %164 = arith.mulf %110, %31 : vector<8x128xf32>
    %165 = arith.addf %164, %34 : vector<8x128xf32>
    %166 = arith.mulf %112, %40 : vector<8x128xf32>
    %167 = arith.addf %166, %43 : vector<8x128xf32>
    %168 = arith.mulf %114, %49 : vector<8x128xf32>
    %169 = arith.addf %168, %53 : vector<8x128xf32>
    %170 = arith.mulf %116, %59 : vector<8x128xf32>
    %171 = arith.addf %170, %63 : vector<8x128xf32>
    %cst_51 = arith.constant 2.000000e+00 : f32
    %172 = vector.broadcast %cst_51 : f32 to vector<8x128xf32>
    %173 = arith.subf %161, %172 : vector<8x128xf32>
    %cst_52 = arith.constant 0.000000e+00 : f32
    %174 = vector.broadcast %cst_52 : f32 to vector<8x128xf32>
    %175 = arith.cmpf ogt, %173, %174 : vector<8x128xf32>
    %176 = arith.extui %175 : vector<8x128xi1> to vector<8x128xi32>
    %177 = arith.sitofp %176 : vector<8x128xi32> to vector<8x128xf32>
    %178 = arith.addf %123, %177 : vector<8x128xf32>
    %c8_i32_53 = arith.constant 8 : i32
    %179 = arith.muli %65, %c8_i32_53 : i32
    %c16_i32 = arith.constant 16 : i32
    %180 = arith.addi %c16_i32, %179 : i32
    %181 = tpu.assume_multiple %180, 8 : i32
    %182 = arith.index_cast %181 : i32 to index
    %c0_54 = arith.constant 0 : index
    %183 = vector.load %arg8[%182, %c0_54] : memref<64x128xf32, #tpu.memory_space<vmem>>, vector<8x128xf32>
    %cst_55 = arith.constant 1.200000e+02 : f32
    %184 = vector.broadcast %cst_55 : f32 to vector<8x128xf32>
    %185 = arith.mulf %184, %167 : vector<8x128xf32>
    %186 = arith.mulf %165, %165 : vector<8x128xf32>
    %187 = arith.mulf %186, %165 : vector<8x128xf32>
    %188 = arith.mulf %185, %187 : vector<8x128xf32>
    %189 = arith.mulf %163, %163 : vector<8x128xf32>
    %190 = arith.mulf %163, %163 : vector<8x128xf32>
    %191 = arith.mulf %189, %190 : vector<8x128xf32>
    %cst_56 = arith.constant 3.600000e+01 : f32
    %192 = vector.broadcast %cst_56 : f32 to vector<8x128xf32>
    %193 = arith.mulf %192, %191 : vector<8x128xf32>
    %194 = arith.mulf %169, %169 : vector<8x128xf32>
    %cst_57 = arith.constant 1.000000e-01 : f32
    %195 = vector.broadcast %cst_57 : f32 to vector<8x128xf32>
    %196 = arith.mulf %195, %194 : vector<8x128xf32>
    %197 = arith.mulf %196, %171 : vector<8x128xf32>
    %198 = arith.addf %188, %193 : vector<8x128xf32>
    %199 = arith.addf %198, %197 : vector<8x128xf32>
    %cst_58 = arith.constant 3.000000e-01 : f32
    %200 = vector.broadcast %cst_58 : f32 to vector<8x128xf32>
    %201 = arith.addf %199, %200 : vector<8x128xf32>
    %cst_59 = arith.constant 1.150000e+02 : f32
    %202 = vector.broadcast %cst_59 : f32 to vector<8x128xf32>
    %203 = arith.mulf %188, %202 : vector<8x128xf32>
    %cst_60 = arith.constant -1.200000e+01 : f32
    %204 = vector.broadcast %cst_60 : f32 to vector<8x128xf32>
    %205 = arith.mulf %193, %204 : vector<8x128xf32>
    %206 = arith.addf %203, %205 : vector<8x128xf32>
    %cst_61 = arith.constant 1.200000e+02 : f32
    %207 = vector.broadcast %cst_61 : f32 to vector<8x128xf32>
    %208 = arith.mulf %197, %207 : vector<8x128xf32>
    %209 = arith.addf %206, %208 : vector<8x128xf32>
    %cst_62 = arith.constant 3.180000e+00 : f32
    %210 = vector.broadcast %cst_62 : f32 to vector<8x128xf32>
    %211 = arith.addf %209, %210 : vector<8x128xf32>
    %212 = arith.mulf %201, %161 : vector<8x128xf32>
    %213 = arith.subf %183, %212 : vector<8x128xf32>
    %214 = arith.addf %213, %211 : vector<8x128xf32>
    %215 = arith.mulf %214, %16 : vector<8x128xf32>
    %216 = arith.addf %161, %215 : vector<8x128xf32>
    %217 = arith.mulf %163, %22 : vector<8x128xf32>
    %218 = arith.addf %217, %25 : vector<8x128xf32>
    %219 = arith.mulf %165, %31 : vector<8x128xf32>
    %220 = arith.addf %219, %34 : vector<8x128xf32>
    %221 = arith.mulf %167, %40 : vector<8x128xf32>
    %222 = arith.addf %221, %43 : vector<8x128xf32>
    %223 = arith.mulf %169, %49 : vector<8x128xf32>
    %224 = arith.addf %223, %53 : vector<8x128xf32>
    %225 = arith.mulf %171, %59 : vector<8x128xf32>
    %226 = arith.addf %225, %63 : vector<8x128xf32>
    %cst_63 = arith.constant 2.000000e+00 : f32
    %227 = vector.broadcast %cst_63 : f32 to vector<8x128xf32>
    %228 = arith.subf %216, %227 : vector<8x128xf32>
    %cst_64 = arith.constant 0.000000e+00 : f32
    %229 = vector.broadcast %cst_64 : f32 to vector<8x128xf32>
    %230 = arith.cmpf ogt, %228, %229 : vector<8x128xf32>
    %231 = arith.extui %230 : vector<8x128xi1> to vector<8x128xi32>
    %232 = arith.sitofp %231 : vector<8x128xi32> to vector<8x128xf32>
    %233 = arith.addf %178, %232 : vector<8x128xf32>
    %c8_i32_65 = arith.constant 8 : i32
    %234 = arith.muli %65, %c8_i32_65 : i32
    %c24_i32 = arith.constant 24 : i32
    %235 = arith.addi %c24_i32, %234 : i32
    %236 = tpu.assume_multiple %235, 8 : i32
    %237 = arith.index_cast %236 : i32 to index
    %c0_66 = arith.constant 0 : index
    %238 = vector.load %arg8[%237, %c0_66] : memref<64x128xf32, #tpu.memory_space<vmem>>, vector<8x128xf32>
    %cst_67 = arith.constant 1.200000e+02 : f32
    %239 = vector.broadcast %cst_67 : f32 to vector<8x128xf32>
    %240 = arith.mulf %239, %222 : vector<8x128xf32>
    %241 = arith.mulf %220, %220 : vector<8x128xf32>
    %242 = arith.mulf %241, %220 : vector<8x128xf32>
    %243 = arith.mulf %240, %242 : vector<8x128xf32>
    %244 = arith.mulf %218, %218 : vector<8x128xf32>
    %245 = arith.mulf %218, %218 : vector<8x128xf32>
    %246 = arith.mulf %244, %245 : vector<8x128xf32>
    %cst_68 = arith.constant 3.600000e+01 : f32
    %247 = vector.broadcast %cst_68 : f32 to vector<8x128xf32>
    %248 = arith.mulf %247, %246 : vector<8x128xf32>
    %249 = arith.mulf %224, %224 : vector<8x128xf32>
    %cst_69 = arith.constant 1.000000e-01 : f32
    %250 = vector.broadcast %cst_69 : f32 to vector<8x128xf32>
    %251 = arith.mulf %250, %249 : vector<8x128xf32>
    %252 = arith.mulf %251, %226 : vector<8x128xf32>
    %253 = arith.addf %243, %248 : vector<8x128xf32>
    %254 = arith.addf %253, %252 : vector<8x128xf32>
    %cst_70 = arith.constant 3.000000e-01 : f32
    %255 = vector.broadcast %cst_70 : f32 to vector<8x128xf32>
    %256 = arith.addf %254, %255 : vector<8x128xf32>
    %cst_71 = arith.constant 1.150000e+02 : f32
    %257 = vector.broadcast %cst_71 : f32 to vector<8x128xf32>
    %258 = arith.mulf %243, %257 : vector<8x128xf32>
    %cst_72 = arith.constant -1.200000e+01 : f32
    %259 = vector.broadcast %cst_72 : f32 to vector<8x128xf32>
    %260 = arith.mulf %248, %259 : vector<8x128xf32>
    %261 = arith.addf %258, %260 : vector<8x128xf32>
    %cst_73 = arith.constant 1.200000e+02 : f32
    %262 = vector.broadcast %cst_73 : f32 to vector<8x128xf32>
    %263 = arith.mulf %252, %262 : vector<8x128xf32>
    %264 = arith.addf %261, %263 : vector<8x128xf32>
    %cst_74 = arith.constant 3.180000e+00 : f32
    %265 = vector.broadcast %cst_74 : f32 to vector<8x128xf32>
    %266 = arith.addf %264, %265 : vector<8x128xf32>
    %267 = arith.mulf %256, %216 : vector<8x128xf32>
    %268 = arith.subf %238, %267 : vector<8x128xf32>
    %269 = arith.addf %268, %266 : vector<8x128xf32>
    %270 = arith.mulf %269, %16 : vector<8x128xf32>
    %271 = arith.addf %216, %270 : vector<8x128xf32>
    %272 = arith.mulf %218, %22 : vector<8x128xf32>
    %273 = arith.addf %272, %25 : vector<8x128xf32>
    %274 = arith.mulf %220, %31 : vector<8x128xf32>
    %275 = arith.addf %274, %34 : vector<8x128xf32>
    %276 = arith.mulf %222, %40 : vector<8x128xf32>
    %277 = arith.addf %276, %43 : vector<8x128xf32>
    %278 = arith.mulf %224, %49 : vector<8x128xf32>
    %279 = arith.addf %278, %53 : vector<8x128xf32>
    %280 = arith.mulf %226, %59 : vector<8x128xf32>
    %281 = arith.addf %280, %63 : vector<8x128xf32>
    %cst_75 = arith.constant 2.000000e+00 : f32
    %282 = vector.broadcast %cst_75 : f32 to vector<8x128xf32>
    %283 = arith.subf %271, %282 : vector<8x128xf32>
    %cst_76 = arith.constant 0.000000e+00 : f32
    %284 = vector.broadcast %cst_76 : f32 to vector<8x128xf32>
    %285 = arith.cmpf ogt, %283, %284 : vector<8x128xf32>
    %286 = arith.extui %285 : vector<8x128xi1> to vector<8x128xi32>
    %287 = arith.sitofp %286 : vector<8x128xi32> to vector<8x128xf32>
    %288 = arith.addf %233, %287 : vector<8x128xf32>
    %c8_i32_77 = arith.constant 8 : i32
    %289 = arith.muli %65, %c8_i32_77 : i32
    %c32_i32 = arith.constant 32 : i32
    %290 = arith.addi %c32_i32, %289 : i32
    %291 = tpu.assume_multiple %290, 8 : i32
    %292 = arith.index_cast %291 : i32 to index
    %c0_78 = arith.constant 0 : index
    %293 = vector.load %arg8[%292, %c0_78] : memref<64x128xf32, #tpu.memory_space<vmem>>, vector<8x128xf32>
    %cst_79 = arith.constant 1.200000e+02 : f32
    %294 = vector.broadcast %cst_79 : f32 to vector<8x128xf32>
    %295 = arith.mulf %294, %277 : vector<8x128xf32>
    %296 = arith.mulf %275, %275 : vector<8x128xf32>
    %297 = arith.mulf %296, %275 : vector<8x128xf32>
    %298 = arith.mulf %295, %297 : vector<8x128xf32>
    %299 = arith.mulf %273, %273 : vector<8x128xf32>
    %300 = arith.mulf %273, %273 : vector<8x128xf32>
    %301 = arith.mulf %299, %300 : vector<8x128xf32>
    %cst_80 = arith.constant 3.600000e+01 : f32
    %302 = vector.broadcast %cst_80 : f32 to vector<8x128xf32>
    %303 = arith.mulf %302, %301 : vector<8x128xf32>
    %304 = arith.mulf %279, %279 : vector<8x128xf32>
    %cst_81 = arith.constant 1.000000e-01 : f32
    %305 = vector.broadcast %cst_81 : f32 to vector<8x128xf32>
    %306 = arith.mulf %305, %304 : vector<8x128xf32>
    %307 = arith.mulf %306, %281 : vector<8x128xf32>
    %308 = arith.addf %298, %303 : vector<8x128xf32>
    %309 = arith.addf %308, %307 : vector<8x128xf32>
    %cst_82 = arith.constant 3.000000e-01 : f32
    %310 = vector.broadcast %cst_82 : f32 to vector<8x128xf32>
    %311 = arith.addf %309, %310 : vector<8x128xf32>
    %cst_83 = arith.constant 1.150000e+02 : f32
    %312 = vector.broadcast %cst_83 : f32 to vector<8x128xf32>
    %313 = arith.mulf %298, %312 : vector<8x128xf32>
    %cst_84 = arith.constant -1.200000e+01 : f32
    %314 = vector.broadcast %cst_84 : f32 to vector<8x128xf32>
    %315 = arith.mulf %303, %314 : vector<8x128xf32>
    %316 = arith.addf %313, %315 : vector<8x128xf32>
    %cst_85 = arith.constant 1.200000e+02 : f32
    %317 = vector.broadcast %cst_85 : f32 to vector<8x128xf32>
    %318 = arith.mulf %307, %317 : vector<8x128xf32>
    %319 = arith.addf %316, %318 : vector<8x128xf32>
    %cst_86 = arith.constant 3.180000e+00 : f32
    %320 = vector.broadcast %cst_86 : f32 to vector<8x128xf32>
    %321 = arith.addf %319, %320 : vector<8x128xf32>
    %322 = arith.mulf %311, %271 : vector<8x128xf32>
    %323 = arith.subf %293, %322 : vector<8x128xf32>
    %324 = arith.addf %323, %321 : vector<8x128xf32>
    %325 = arith.mulf %324, %16 : vector<8x128xf32>
    %326 = arith.addf %271, %325 : vector<8x128xf32>
    %327 = arith.mulf %273, %22 : vector<8x128xf32>
    %328 = arith.addf %327, %25 : vector<8x128xf32>
    %329 = arith.mulf %275, %31 : vector<8x128xf32>
    %330 = arith.addf %329, %34 : vector<8x128xf32>
    %331 = arith.mulf %277, %40 : vector<8x128xf32>
    %332 = arith.addf %331, %43 : vector<8x128xf32>
    %333 = arith.mulf %279, %49 : vector<8x128xf32>
    %334 = arith.addf %333, %53 : vector<8x128xf32>
    %335 = arith.mulf %281, %59 : vector<8x128xf32>
    %336 = arith.addf %335, %63 : vector<8x128xf32>
    %cst_87 = arith.constant 2.000000e+00 : f32
    %337 = vector.broadcast %cst_87 : f32 to vector<8x128xf32>
    %338 = arith.subf %326, %337 : vector<8x128xf32>
    %cst_88 = arith.constant 0.000000e+00 : f32
    %339 = vector.broadcast %cst_88 : f32 to vector<8x128xf32>
    %340 = arith.cmpf ogt, %338, %339 : vector<8x128xf32>
    %341 = arith.extui %340 : vector<8x128xi1> to vector<8x128xi32>
    %342 = arith.sitofp %341 : vector<8x128xi32> to vector<8x128xf32>
    %343 = arith.addf %288, %342 : vector<8x128xf32>
    %c8_i32_89 = arith.constant 8 : i32
    %344 = arith.muli %65, %c8_i32_89 : i32
    %c40_i32 = arith.constant 40 : i32
    %345 = arith.addi %c40_i32, %344 : i32
    %346 = tpu.assume_multiple %345, 8 : i32
    %347 = arith.index_cast %346 : i32 to index
    %c0_90 = arith.constant 0 : index
    %348 = vector.load %arg8[%347, %c0_90] : memref<64x128xf32, #tpu.memory_space<vmem>>, vector<8x128xf32>
    %cst_91 = arith.constant 1.200000e+02 : f32
    %349 = vector.broadcast %cst_91 : f32 to vector<8x128xf32>
    %350 = arith.mulf %349, %332 : vector<8x128xf32>
    %351 = arith.mulf %330, %330 : vector<8x128xf32>
    %352 = arith.mulf %351, %330 : vector<8x128xf32>
    %353 = arith.mulf %350, %352 : vector<8x128xf32>
    %354 = arith.mulf %328, %328 : vector<8x128xf32>
    %355 = arith.mulf %328, %328 : vector<8x128xf32>
    %356 = arith.mulf %354, %355 : vector<8x128xf32>
    %cst_92 = arith.constant 3.600000e+01 : f32
    %357 = vector.broadcast %cst_92 : f32 to vector<8x128xf32>
    %358 = arith.mulf %357, %356 : vector<8x128xf32>
    %359 = arith.mulf %334, %334 : vector<8x128xf32>
    %cst_93 = arith.constant 1.000000e-01 : f32
    %360 = vector.broadcast %cst_93 : f32 to vector<8x128xf32>
    %361 = arith.mulf %360, %359 : vector<8x128xf32>
    %362 = arith.mulf %361, %336 : vector<8x128xf32>
    %363 = arith.addf %353, %358 : vector<8x128xf32>
    %364 = arith.addf %363, %362 : vector<8x128xf32>
    %cst_94 = arith.constant 3.000000e-01 : f32
    %365 = vector.broadcast %cst_94 : f32 to vector<8x128xf32>
    %366 = arith.addf %364, %365 : vector<8x128xf32>
    %cst_95 = arith.constant 1.150000e+02 : f32
    %367 = vector.broadcast %cst_95 : f32 to vector<8x128xf32>
    %368 = arith.mulf %353, %367 : vector<8x128xf32>
    %cst_96 = arith.constant -1.200000e+01 : f32
    %369 = vector.broadcast %cst_96 : f32 to vector<8x128xf32>
    %370 = arith.mulf %358, %369 : vector<8x128xf32>
    %371 = arith.addf %368, %370 : vector<8x128xf32>
    %cst_97 = arith.constant 1.200000e+02 : f32
    %372 = vector.broadcast %cst_97 : f32 to vector<8x128xf32>
    %373 = arith.mulf %362, %372 : vector<8x128xf32>
    %374 = arith.addf %371, %373 : vector<8x128xf32>
    %cst_98 = arith.constant 3.180000e+00 : f32
    %375 = vector.broadcast %cst_98 : f32 to vector<8x128xf32>
    %376 = arith.addf %374, %375 : vector<8x128xf32>
    %377 = arith.mulf %366, %326 : vector<8x128xf32>
    %378 = arith.subf %348, %377 : vector<8x128xf32>
    %379 = arith.addf %378, %376 : vector<8x128xf32>
    %380 = arith.mulf %379, %16 : vector<8x128xf32>
    %381 = arith.addf %326, %380 : vector<8x128xf32>
    %382 = arith.mulf %328, %22 : vector<8x128xf32>
    %383 = arith.addf %382, %25 : vector<8x128xf32>
    %384 = arith.mulf %330, %31 : vector<8x128xf32>
    %385 = arith.addf %384, %34 : vector<8x128xf32>
    %386 = arith.mulf %332, %40 : vector<8x128xf32>
    %387 = arith.addf %386, %43 : vector<8x128xf32>
    %388 = arith.mulf %334, %49 : vector<8x128xf32>
    %389 = arith.addf %388, %53 : vector<8x128xf32>
    %390 = arith.mulf %336, %59 : vector<8x128xf32>
    %391 = arith.addf %390, %63 : vector<8x128xf32>
    %cst_99 = arith.constant 2.000000e+00 : f32
    %392 = vector.broadcast %cst_99 : f32 to vector<8x128xf32>
    %393 = arith.subf %381, %392 : vector<8x128xf32>
    %cst_100 = arith.constant 0.000000e+00 : f32
    %394 = vector.broadcast %cst_100 : f32 to vector<8x128xf32>
    %395 = arith.cmpf ogt, %393, %394 : vector<8x128xf32>
    %396 = arith.extui %395 : vector<8x128xi1> to vector<8x128xi32>
    %397 = arith.sitofp %396 : vector<8x128xi32> to vector<8x128xf32>
    %398 = arith.addf %343, %397 : vector<8x128xf32>
    %c8_i32_101 = arith.constant 8 : i32
    %399 = arith.muli %65, %c8_i32_101 : i32
    %c48_i32 = arith.constant 48 : i32
    %400 = arith.addi %c48_i32, %399 : i32
    %401 = tpu.assume_multiple %400, 8 : i32
    %402 = arith.index_cast %401 : i32 to index
    %c0_102 = arith.constant 0 : index
    %403 = vector.load %arg8[%402, %c0_102] : memref<64x128xf32, #tpu.memory_space<vmem>>, vector<8x128xf32>
    %cst_103 = arith.constant 1.200000e+02 : f32
    %404 = vector.broadcast %cst_103 : f32 to vector<8x128xf32>
    %405 = arith.mulf %404, %387 : vector<8x128xf32>
    %406 = arith.mulf %385, %385 : vector<8x128xf32>
    %407 = arith.mulf %406, %385 : vector<8x128xf32>
    %408 = arith.mulf %405, %407 : vector<8x128xf32>
    %409 = arith.mulf %383, %383 : vector<8x128xf32>
    %410 = arith.mulf %383, %383 : vector<8x128xf32>
    %411 = arith.mulf %409, %410 : vector<8x128xf32>
    %cst_104 = arith.constant 3.600000e+01 : f32
    %412 = vector.broadcast %cst_104 : f32 to vector<8x128xf32>
    %413 = arith.mulf %412, %411 : vector<8x128xf32>
    %414 = arith.mulf %389, %389 : vector<8x128xf32>
    %cst_105 = arith.constant 1.000000e-01 : f32
    %415 = vector.broadcast %cst_105 : f32 to vector<8x128xf32>
    %416 = arith.mulf %415, %414 : vector<8x128xf32>
    %417 = arith.mulf %416, %391 : vector<8x128xf32>
    %418 = arith.addf %408, %413 : vector<8x128xf32>
    %419 = arith.addf %418, %417 : vector<8x128xf32>
    %cst_106 = arith.constant 3.000000e-01 : f32
    %420 = vector.broadcast %cst_106 : f32 to vector<8x128xf32>
    %421 = arith.addf %419, %420 : vector<8x128xf32>
    %cst_107 = arith.constant 1.150000e+02 : f32
    %422 = vector.broadcast %cst_107 : f32 to vector<8x128xf32>
    %423 = arith.mulf %408, %422 : vector<8x128xf32>
    %cst_108 = arith.constant -1.200000e+01 : f32
    %424 = vector.broadcast %cst_108 : f32 to vector<8x128xf32>
    %425 = arith.mulf %413, %424 : vector<8x128xf32>
    %426 = arith.addf %423, %425 : vector<8x128xf32>
    %cst_109 = arith.constant 1.200000e+02 : f32
    %427 = vector.broadcast %cst_109 : f32 to vector<8x128xf32>
    %428 = arith.mulf %417, %427 : vector<8x128xf32>
    %429 = arith.addf %426, %428 : vector<8x128xf32>
    %cst_110 = arith.constant 3.180000e+00 : f32
    %430 = vector.broadcast %cst_110 : f32 to vector<8x128xf32>
    %431 = arith.addf %429, %430 : vector<8x128xf32>
    %432 = arith.mulf %421, %381 : vector<8x128xf32>
    %433 = arith.subf %403, %432 : vector<8x128xf32>
    %434 = arith.addf %433, %431 : vector<8x128xf32>
    %435 = arith.mulf %434, %16 : vector<8x128xf32>
    %436 = arith.addf %381, %435 : vector<8x128xf32>
    %437 = arith.mulf %383, %22 : vector<8x128xf32>
    %438 = arith.addf %437, %25 : vector<8x128xf32>
    %439 = arith.mulf %385, %31 : vector<8x128xf32>
    %440 = arith.addf %439, %34 : vector<8x128xf32>
    %441 = arith.mulf %387, %40 : vector<8x128xf32>
    %442 = arith.addf %441, %43 : vector<8x128xf32>
    %443 = arith.mulf %389, %49 : vector<8x128xf32>
    %444 = arith.addf %443, %53 : vector<8x128xf32>
    %445 = arith.mulf %391, %59 : vector<8x128xf32>
    %446 = arith.addf %445, %63 : vector<8x128xf32>
    %cst_111 = arith.constant 2.000000e+00 : f32
    %447 = vector.broadcast %cst_111 : f32 to vector<8x128xf32>
    %448 = arith.subf %436, %447 : vector<8x128xf32>
    %cst_112 = arith.constant 0.000000e+00 : f32
    %449 = vector.broadcast %cst_112 : f32 to vector<8x128xf32>
    %450 = arith.cmpf ogt, %448, %449 : vector<8x128xf32>
    %451 = arith.extui %450 : vector<8x128xi1> to vector<8x128xi32>
    %452 = arith.sitofp %451 : vector<8x128xi32> to vector<8x128xf32>
    %453 = arith.addf %398, %452 : vector<8x128xf32>
    %c8_i32_113 = arith.constant 8 : i32
    %454 = arith.muli %65, %c8_i32_113 : i32
    %c56_i32 = arith.constant 56 : i32
    %455 = arith.addi %c56_i32, %454 : i32
    %456 = tpu.assume_multiple %455, 8 : i32
    %457 = arith.index_cast %456 : i32 to index
    %c0_114 = arith.constant 0 : index
    %458 = vector.load %arg8[%457, %c0_114] : memref<64x128xf32, #tpu.memory_space<vmem>>, vector<8x128xf32>
    %cst_115 = arith.constant 1.200000e+02 : f32
    %459 = vector.broadcast %cst_115 : f32 to vector<8x128xf32>
    %460 = arith.mulf %459, %442 : vector<8x128xf32>
    %461 = arith.mulf %440, %440 : vector<8x128xf32>
    %462 = arith.mulf %461, %440 : vector<8x128xf32>
    %463 = arith.mulf %460, %462 : vector<8x128xf32>
    %464 = arith.mulf %438, %438 : vector<8x128xf32>
    %465 = arith.mulf %438, %438 : vector<8x128xf32>
    %466 = arith.mulf %464, %465 : vector<8x128xf32>
    %cst_116 = arith.constant 3.600000e+01 : f32
    %467 = vector.broadcast %cst_116 : f32 to vector<8x128xf32>
    %468 = arith.mulf %467, %466 : vector<8x128xf32>
    %469 = arith.mulf %444, %444 : vector<8x128xf32>
    %cst_117 = arith.constant 1.000000e-01 : f32
    %470 = vector.broadcast %cst_117 : f32 to vector<8x128xf32>
    %471 = arith.mulf %470, %469 : vector<8x128xf32>
    %472 = arith.mulf %471, %446 : vector<8x128xf32>
    %473 = arith.addf %463, %468 : vector<8x128xf32>
    %474 = arith.addf %473, %472 : vector<8x128xf32>
    %cst_118 = arith.constant 3.000000e-01 : f32
    %475 = vector.broadcast %cst_118 : f32 to vector<8x128xf32>
    %476 = arith.addf %474, %475 : vector<8x128xf32>
    %cst_119 = arith.constant 1.150000e+02 : f32
    %477 = vector.broadcast %cst_119 : f32 to vector<8x128xf32>
    %478 = arith.mulf %463, %477 : vector<8x128xf32>
    %cst_120 = arith.constant -1.200000e+01 : f32
    %479 = vector.broadcast %cst_120 : f32 to vector<8x128xf32>
    %480 = arith.mulf %468, %479 : vector<8x128xf32>
    %481 = arith.addf %478, %480 : vector<8x128xf32>
    %cst_121 = arith.constant 1.200000e+02 : f32
    %482 = vector.broadcast %cst_121 : f32 to vector<8x128xf32>
    %483 = arith.mulf %472, %482 : vector<8x128xf32>
    %484 = arith.addf %481, %483 : vector<8x128xf32>
    %cst_122 = arith.constant 3.180000e+00 : f32
    %485 = vector.broadcast %cst_122 : f32 to vector<8x128xf32>
    %486 = arith.addf %484, %485 : vector<8x128xf32>
    %487 = arith.mulf %476, %436 : vector<8x128xf32>
    %488 = arith.subf %458, %487 : vector<8x128xf32>
    %489 = arith.addf %488, %486 : vector<8x128xf32>
    %490 = arith.mulf %489, %16 : vector<8x128xf32>
    %491 = arith.addf %436, %490 : vector<8x128xf32>
    %cst_123 = arith.constant 2.000000e+00 : f32
    %492 = vector.broadcast %cst_123 : f32 to vector<8x128xf32>
    %493 = arith.subf %491, %492 : vector<8x128xf32>
    %cst_124 = arith.constant 0.000000e+00 : f32
    %494 = vector.broadcast %cst_124 : f32 to vector<8x128xf32>
    %495 = arith.cmpf ogt, %493, %494 : vector<8x128xf32>
    %496 = arith.extui %495 : vector<8x128xi1> to vector<8x128xi32>
    %497 = arith.sitofp %496 : vector<8x128xi32> to vector<8x128xf32>
    %498 = arith.addf %453, %497 : vector<8x128xf32>
    %c0_125 = arith.constant 0 : index
    %c0_126 = arith.constant 0 : index
    %499 = vector.load %arg5[%c0_125, %c0_126] : memref<128x4xf32, #tpu.memory_space<vmem>>, vector<128x4xf32>
    %cst_127 = arith.constant dense<0.000000e+00> : vector<8x4xf32>
    %500 = tpu.matmul %498, %499, %cst_127 {dimension_numbers = #tpu.dot_dimension_numbers<[1], [0], [0], [1], [0, 0, 1, 1], [], []>} : vector<8x128xf32>, vector<128x4xf32>, vector<8x4xf32> -> vector<8x4xf32>
    %c0_128 = arith.constant 0 : index
    %c0_129 = arith.constant 0 : index
    %501 = vector.load %arg6[%c0_128, %c0_129] : memref<1x4xf32, #tpu.memory_space<vmem>>, vector<1x4xf32>
    %502 = vector.broadcast %501 : vector<1x4xf32> to vector<8x4xf32>
    %503 = arith.addf %500, %502 : vector<8x4xf32>
    %504 = arith.index_cast %67 : i32 to index
    %c0_130 = arith.constant 0 : index
    %505 = vector.load %arg7[%504, %c0_130] : memref<8x4xf32, #tpu.memory_space<vmem>>, vector<8x4xf32>
    tpu.vector_store %arg7[%504, %c0_130], %503 {strides = array<i32>} : memref<8x4xf32, #tpu.memory_space<vmem>>, vector<8x4xf32>,
    %c1_i32_131 = arith.constant 1 : i32
    return
  }
  func.func @transform_0(%arg0: i32) -> (i32, i32, i32) {
    %c0_i32 = arith.constant 0 : i32
    %c0_i32_0 = arith.constant 0 : i32
    %c0_i32_1 = arith.constant 0 : i32
    return %c0_i32, %arg0, %c0_i32_0 : i32, i32, i32
  }
  func.func @transform_1(%arg0: i32) -> (i32, i32) {
    %c0_i32 = arith.constant 0 : i32
    %c0_i32_0 = arith.constant 0 : i32
    %c0_i32_1 = arith.constant 0 : i32
    return %c0_i32, %c0_i32_0 : i32, i32
  }
  func.func @transform_2(%arg0: i32) -> (i32, i32) {
    %c0_i32 = arith.constant 0 : i32
    %c0_i32_0 = arith.constant 0 : i32
    %c0_i32_1 = arith.constant 0 : i32
    return %c0_i32, %c0_i32_0 : i32, i32
  }
  func.func @transform_3(%arg0: i32) -> (i32, i32) {
    %c0_i32 = arith.constant 0 : i32
    %c0_i32_0 = arith.constant 0 : i32
    %c0_i32_1 = arith.constant 0 : i32
    return %c0_i32, %c0_i32_0 : i32, i32
  }
  func.func @transform_4(%arg0: i32) -> (i32, i32) {
    %c0_i32 = arith.constant 0 : i32
    %c0_i32_0 = arith.constant 0 : i32
    %c0_i32_1 = arith.constant 0 : i32
    return %c0_i32, %c0_i32_0 : i32, i32
  }
  func.func @transform_5(%arg0: i32) -> (i32, i32) {
    %c0_i32 = arith.constant 0 : i32
    %c0_i32_0 = arith.constant 0 : i32
    %c0_i32_1 = arith.constant 0 : i32
    return %c0_i32, %c0_i32_0 : i32, i32
  }
  func.func @transform_6(%arg0: i32) -> (i32, i32) {
    %c0_i32 = arith.constant 0 : i32
    %c0_i32_0 = arith.constant 0 : i32
    return %arg0, %c0_i32 : i32, i32
  }
}

</mosaic_0001>

<bundles_post_ra>
// kernel: _lambda_.1
= control target key start
LH: loop header
LB: loop body
LE: loop exit
PB: predicated region body
PF: predicated region fallthrough
CT: control target
= control target key end

     0   :  { %vm62_vm0 = vcmask 1043456   ;;  %vm37_vm1 = vcmask 97280   ;;  %vm487_vm10 = vcmask 31744   ;;  %s811_s1 = inlined_call_operand.vmem [shape: f32[12,128], index: 1, kind: input, shape index: {}]   ;;  %s812_s0 = inlined_call_operand.vmem [shape: f32[8,8,12], index: 0, kind: input, shape index: {}]   ;;  %s813_s2 = inlined_call_operand.vmem [shape: f32[1,128], index: 2, kind: input, shape index: {}]   ;;  %s814_s3 = inlined_call_operand.vmem [shape: f32[7,128], index: 3, kind: input, shape index: {}]   ;;  %s815_s5 = inlined_call_operand.vmem [shape: f32[1,4], index: 5, kind: input, shape index: {}]   ;;  %s816_s4 = inlined_call_operand.vmem [shape: f32[128,4], index: 4, kind: input, shape index: {}]   ;;  %s817_s6 = inlined_call_operand.vmem [shape: f32[8,4], index: 6, kind: output, shape index: {}]  }
   0x1   :  { %v32_v0 = vld [vmem:[%s811_s1 + $0x8] sm:$0xf]  ;;  %v31_v1 = vld [vmem:[%s811_s1] sm:$0xff]  ;;  %v26_v3 = vld [vmem:[%s812_s0 + $0x18] sm:$0xff] }
   0x2   :  { %493 = vmatpush.msk.msra.mxu0 %vm62_vm0, %v32_v0  ;;  %v23_v2 = vld [vmem:[%s812_s0] sm:$0xff]  ;;  %518 = vmatpush.msk.msra.mxu2 %vm62_vm0, %v32_v0  ;;  %v24_v5 = vld [vmem:[%s812_s0 + $0x8] sm:$0xff]  ;;  %v25_v7 = vld [vmem:[%s812_s0 + $0x10] sm:$0xff] }
   0x3   :  { %519 = vmatpush.msk.msra.mxu3 %vm62_vm0, %v32_v0  ;;  %v27_v4 = vld [vmem:[%s812_s0 + $0x20] sm:$0xff]  ;;  %v28_v6 = vld [vmem:[%s812_s0 + $0x28] sm:$0xff]  ;;  %v29_v8 = vld [vmem:[%s812_s0 + $0x30] sm:$0xff] }
   0x4   :  { %81 = vmatpush.msra.mxu0 %v31_v1  ;;  %520 = vmatpush.msra.mxu2 %v31_v1  ;;  %v30_v9 = vld [vmem:[%s812_s0 + $0x38] sm:$0xff]  ;;  %v116_v10 = vld [vmem:[%s814_s3 + $0x1] sm:$0x1]  ;;  %v117_v11 = vld [vmem:[%s814_s3 + $0x2] sm:$0x1] }
   0x5   :  { %494 = vmatmul.msk.f32.vlgmr.msra.gmra.mxu0 %vm37_vm1, %v23_v2  ;;  %497 = vmatmul.msk.f32.vlgmr.msra.gmra.mxu2 %vm37_vm1, %v26_v3  ;;  %v118_v12 = vld [vmem:[%s814_s3 + $0x3] sm:$0x1]  ;;  %v119_v13 = vld [vmem:[%s814_s3 + $0x4] sm:$0x1]  ;;  %v120_v14 = vld [vmem:[%s814_s3 + $0x5] sm:$0x1]  ;;  %v123_v16 = vadd.f32 %v117_v11, %v116_v10 }
   0x6   :  { %521 = vmatpush.msra.mxu3 %v31_v1  ;;  %v121_v15 = vld [vmem:[%s814_s3 + $0x6] sm:$0x1]  ;;  %v129_v17 = vadd.f32 %v119_v13, %v118_v12  ;;  %v115_v18 = vld [vmem:[%s814_s3] sm:$0x1] }
   0x7   :  { %498 = vmatmul.msk.f32.vlgmr.msra.gmra.mxu3 %vm37_vm1, %v27_v4  ;;  %v135_v19 = vadd.f32 %v121_v15, %v120_v14  ;;  %v124_v20 = vmul.f32 %v123_v16, %v115_v18  ;;  %v141_v25 = vmul.f32 0.995, %v115_v18  ;;  %v127_v26 = vmul.f32 %v116_v10, %v115_v18 }
   0x8   :  { %v130_v21 = vmul.f32 %v129_v17, %v115_v18  ;;  %v133_v27 = vmul.f32 %v118_v12, %v115_v18  ;;  %v139_v35 = vmul.f32 %v120_v14, %v115_v18  ;;  %v144_v36 = vmul.f32 0.055, %v115_v18 }
   0x9   :  { %v136_v22 = vmul.f32 %v135_v19, %v115_v18  ;;  %v125_v23 = vsub.f32 1.0, %v124_v20  ;;  %v142_v31 = vsub.f32 1.0, %v141_v25  ;;  %v625_v32 = vperm.slane %v127_v26, 0  ;;  %v665_v20 = vld [vmem:[%s813_s2] ss:$0 sm:$0xff] }
   0xa   :  { %v131_v24 = vsub.f32 1.0, %v130_v21  ;;  %v627_v33 = vperm.slane %v133_v27, 0  ;;  %v146_v38 = vmul.f32 0.006957, %v115_v18  ;;  %v635_v41 = vperm.slane %v139_v35, 0 }
   0xb   :  { %v137_v28 = vsub.f32 1.0, %v136_v22  ;;  %v621_v29 = vperm.slane %v125_v23, 0  ;;  %v631_v37 = vperm.slane %v142_v31, 0  ;;  %v637_v42 = vperm.slane %v144_v36, 0 }
   0xc   :  { %v623_v30 = vperm.slane %v131_v24, 0  ;;  %v147_v44 = vsub.f32 1.0, %v146_v38  ;;  %v149_v48 = vmul.f32 0.000457, %v115_v18 }
   0xd   :  { %495 = vmatmul.msk.f32.gmra.mxu0 %vm37_vm1, %v24_v5  ;;  %v629_v34 = vperm.slane %v137_v28, 0  ;;  %v155_v39 = vmul.f32 0.0, %v621_v29  ;;  %v161_v47 = vmul.f32 0.0, %v631_v37 }
   0xe   :  { %v157_v40 = vmul.f32 0.0, %v623_v30  ;;  %v644_v50 = vperm.slane %v147_v44, 0  ;;  %v649_v56 = vperm.slane %v149_v48, 0 }
   0xf   :  { %499 = vmatmul.msk.f32.gmra.mxu3 %vm37_vm1, %v28_v6  ;;  %v159_v43 = vmul.f32 0.0, %v629_v34  ;;  %v156_v45 = vadd.f32 %v155_v39, %v625_v32  ;;  %v162_v51 = vadd.f32 %v161_v47, %v637_v42 }
  0x10   :  { %v158_v46 = vadd.f32 %v157_v40, %v627_v33  ;;  %v163_v58 = vmul.f32 0.0, %v644_v50  ;;  %v676_v40 = vld [vmem:[%s814_s3] ss:$0 sm:$0xff] }
  0x11   :  { %v160_v49 = vadd.f32 %v159_v43, %v635_v41  ;;  %v176_v53 = vmul.f32 %v156_v45, %v156_v45  ;;  %v196_v54 = vmul.f32 %v156_v45, %v621_v29  ;;  %v179_v61 = vmul.f32 %v162_v51, %v162_v51 }
  0x12   :  { %v173_v52 = vmul.f32 %v158_v46, %v158_v46  ;;  %v198_v55 = vmul.f32 %v158_v46, %v623_v30  ;;  %v202_v1 = vmul.f32 %v162_v51, %v631_v37  ;;  %v164_v2 = vadd.f32 %v163_v58, %v649_v56 }
  0x13   :  { %v172_v57 = vmul.f32 120.0, %v160_v49  ;;  %v177_v60 = vmul.f32 %v176_v53, %v176_v53  ;;  %v197_v62 = vadd.f32 %v196_v54, %v625_v32  ;;  %v200_v0 = vmul.f32 %v160_v49, %v629_v34 }
  0x14   :  { %v174_v59 = vmul.f32 %v173_v52, %v158_v46  ;;  %v199_v63 = vadd.f32 %v198_v55, %v627_v33  ;;  %v180_v5 = vmul.f32 0.1, %v179_v61  ;;  %v204_v13 = vmul.f32 %v164_v2, %v644_v50 }
  0x15   :  { %496 = vmatmul.msk.f32.gmra.mxu0 %vm37_vm1, %v25_v7  ;;  %v178_v4 = vmul.f32 36.0, %v177_v60  ;;  %v201_v6 = vadd.f32 %v200_v0, %v635_v41  ;;  %v203_v7 = vadd.f32 %v202_v1, %v637_v42  ;;  %v237_v14 = vmul.f32 %v197_v62, %v621_v29 }
  0x16   :  { %v175_v3 = vmul.f32 %v174_v59, %v172_v57  ;;  %v181_v12 = vmul.f32 %v180_v5, %v164_v2  ;;  %v239_v15 = vmul.f32 %v199_v63, %v623_v30  ;;  %v205_v31 = vadd.f32 %v204_v13, %v649_v56 }
  0x17   :  { %500 = vmatmul.msk.f32.gmra.mxu3 %vm37_vm1, %v29_v8  ;;  %v214_v8 = vmul.f32 %v199_v63, %v199_v63  ;;  %v186_v11 = vmul.f32 -12.0, %v178_v4  ;;  %v213_v16 = vmul.f32 120.0, %v201_v6  ;;  %v220_v19 = vmul.f32 %v203_v7, %v203_v7 }
  0x18   :  { %v185_v10 = vmul.f32 115.0, %v175_v3  ;;  %v182_v21 = vadd.f32 %v178_v4, %v175_v3  ;;  %v188_v23 = vmul.f32 120.0, %v181_v12  ;;  %v243_v24 = vmul.f32 %v203_v7, %v631_v37 }
  0x19   :  { %v215_v17 = vmul.f32 %v214_v8, %v199_v63  ;;  %v238_v25 = vadd.f32 %v237_v14, %v625_v32  ;;  %v240_v26 = vadd.f32 %v239_v15, %v627_v33  ;;  %v241_v27 = vmul.f32 %v201_v6, %v629_v34 }
  0x1a   :  { %v187_v22 = vadd.f32 %v186_v11, %v185_v10  ;;  %v221_v38 = vmul.f32 0.1, %v220_v19  ;;  %v183_v43 = vadd.f32 %v182_v21, %v181_v12  ;;  %v244_v45 = vadd.f32 %v243_v24, %v637_v42 }
  0x1b   :  { %v216_v35 = vmul.f32 %v215_v17, %v213_v16  ;;  %v242_v47 = vadd.f32 %v241_v27, %v635_v41  ;;  %v255_v48 = vmul.f32 %v240_v26, %v240_v26  ;;  %v258_v49 = vmul.f32 %v238_v25, %v238_v25 }
  0x1c   :  { %v189_v44 = vadd.f32 %v188_v23, %v187_v22  ;;  %v222_v51 = vmul.f32 %v221_v38, %v205_v31  ;;  %v184_v57 = vadd.f32 0.3, %v183_v43  ;;  %v245_v58 = vmul.f32 %v205_v31, %v644_v50 }
  0x1d   :  { %v226_v53 = vmul.f32 115.0, %v216_v35  ;;  %v261_v59 = vmul.f32 %v244_v45, %v244_v45  ;;  %v278_v60 = vmul.f32 %v238_v25, %v621_v29  ;;  %v280_v61 = vmul.f32 %v240_v26, %v623_v30 }
  0x1e   :  { %v256_v63 = vmul.f32 %v255_v48, %v240_v26  ;;  %v259_v0 = vmul.f32 %v258_v49, %v258_v49  ;;  %v190_v2 = vadd.f32 3.18, %v189_v44  ;;  %v229_v5 = vmul.f32 120.0, %v222_v51 }
  0x1f   :  { %501 = vmatmul.msk.f32.gmra.mxu3 %vm37_vm1, %v30_v9  ;;  %v217_v9 = vmul.f32 %v197_v62, %v197_v62  ;;  %v254_v62 = vmul.f32 120.0, %v242_v47  ;;  %v246_v8 = vadd.f32 %v245_v58, %v649_v56  ;;  %v262_v10 = vmul.f32 0.1, %v261_v59 }
  0x20   :  { %v279_v11 = vadd.f32 %v278_v60, %v625_v32  ;;  %v281_v12 = vadd.f32 %v280_v61, %v627_v33  ;;  %v282_v13 = vmul.f32 %v242_v47, %v629_v34  ;;  %v260_v16 = vmul.f32 36.0, %v259_v0  ;;  %v462_v0 = vld [vmem:[%s816_s4 + $0x78] sm:$0xff] }
  0x21   :  { %v218_v18 = vmul.f32 %v217_v9, %v217_v9  ;;  %v284_v9 = vmul.f32 %v244_v45, %v631_v37  ;;  %v257_v15 = vmul.f32 %v256_v63, %v254_v62  ;;  %v263_v22 = vmul.f32 %v262_v10, %v246_v8  ;;  %467 = vmatpush.msra.mxu1 %v462_v0 }
  0x22   :  { %v283_v23 = vadd.f32 %v282_v13, %v635_v41  ;;  %v296_v24 = vmul.f32 %v281_v12, %v281_v12  ;;  %v299_v25 = vmul.f32 %v279_v11, %v279_v11  ;;  %v268_v31 = vmul.f32 -12.0, %v260_v16 }
  0x23   :  { %v219_v36 = vmul.f32 36.0, %v218_v18  ;;  %v285_v21 = vadd.f32 %v284_v9, %v637_v42  ;;  %v264_v27 = vadd.f32 %v260_v16, %v257_v15  ;;  %v321_v38 = vmul.f32 %v281_v12, %v623_v30 }
  0x24   :  { %v286_v44 = vmul.f32 %v246_v8, %v644_v50  ;;  %v297_v47 = vmul.f32 %v296_v24, %v281_v12  ;;  %v300_v48 = vmul.f32 %v299_v25, %v299_v25  ;;  %v323_v58 = vmul.f32 %v283_v23, %v629_v34  ;;  %v459_v24 = vld [vmem:[%s816_s4 + $0x60] sm:$0xff] }
  0x25   :  { %v223_v52 = vadd.f32 %v219_v36, %v216_v35  ;;  %v227_v54 = vmul.f32 -12.0, %v219_v36  ;;  %v319_v36 = vmul.f32 %v279_v11, %v621_v29  ;;  %v302_v45 = vmul.f32 %v285_v21, %v285_v21 }
  0x26   :  { %v325_v59 = vmul.f32 %v285_v21, %v631_v37  ;;  %v270_v61 = vmul.f32 120.0, %v263_v22  ;;  %v287_v62 = vadd.f32 %v286_v44, %v649_v56 }
  0x27   :  { %v224_v3 = vadd.f32 %v223_v52, %v222_v51  ;;  %v228_v4 = vadd.f32 %v227_v54, %v226_v53  ;;  %v265_v52 = vadd.f32 %v264_v27, %v263_v22  ;;  %v320_v54 = vadd.f32 %v319_v36, %v625_v32  ;;  %v458_v36 = vld [vmem:[%s816_s4 + $0x58] sm:$0xff] }
  0x28   :  { %v303_v63 = vmul.f32 0.1, %v302_v45 }
  0x29   :  { %v225_v18 = vadd.f32 0.3, %v224_v3  ;;  %v230_v19 = vadd.f32 %v229_v5, %v228_v4  ;;  %v461_v4 = vld [vmem:[%s816_s4 + $0x70] sm:$0xff]  ;;  %v340_v9 = vmul.f32 %v320_v54, %v320_v54  ;;  %v266_v11 = vadd.f32 0.3, %v265_v52 }
  0x2a   :  { %468 = vmatpush.msra.mxu1 %v461_v4  ;;  %v304_v13 = vmul.f32 %v303_v63, %v287_v62  ;;  %v455_v4 = vld [vmem:[%s816_s4 + $0x40] sm:$0xff] }
  0x2b   :  { %v231_v49 = vadd.f32 3.18, %v230_v19  ;;  %v341_v27 = vmul.f32 %v340_v9, %v340_v9 }
  0x82   :  { %v83_v28 = vpop.f32.mrf.mxu0 }
  0x83   :  { %v84_v39 = vadd.f32 %v665_v20, %v83_v28  ;;  %v267_v28 = vmul.f32 115.0, %v257_v15 }
  0x85   :  { %v152_v46 = vadd.f32 3.18, %v84_v39  ;;  %v269_v53 = vadd.f32 %v268_v31, %v267_v28 }
  0x87   :  { %v681_v55 = vmul.f32 %v676_v40, %v152_v46  ;;  %v295_v46 = vmul.f32 120.0, %v283_v23  ;;  %v271_v12 = vadd.f32 %v270_v61, %v269_v53  ;;  %v327_v23 = vmul.f32 %v287_v62, %v644_v50 }
  0x88   :  { %v92_v5 = vpop.f32.mrf.mxu2 }
  0x89   :  { %v191_v7 = vmul.f32 %v184_v57, %v681_v55  ;;  %v322_v57 = vadd.f32 %v321_v38, %v627_v33  ;;  %v93_v21 = vadd.f32 %v665_v20, %v92_v5  ;;  %v272_v31 = vadd.f32 3.18, %v271_v12 }
  0x8a   :  { %v86_v1 = vpop.f32.mrf.mxu0  ;;  %v328_v52 = vadd.f32 %v327_v23, %v649_v56 }
  0x8b   :  { %v87_v6 = vadd.f32 %v665_v20, %v86_v1  ;;  %v298_v1 = vmul.f32 %v297_v47, %v295_v46  ;;  %v337_v8 = vmul.f32 %v322_v57, %v322_v57 }
  0x8d   :  { %v192_v14 = vsub.f32 %v87_v6, %v191_v7  ;;  %v324_v6 = vadd.f32 %v323_v58, %v635_v41  ;;  %v326_v7 = vadd.f32 %v325_v59, %v637_v42  ;;  %v308_v16 = vmul.f32 115.0, %v298_v1  ;;  %v456_v59 = vld [vmem:[%s816_s4 + $0x48] sm:$0xff] }
  0x8f   :  { %v193_v17 = vadd.f32 %v192_v14, %v190_v2  ;;  %v301_v2 = vmul.f32 36.0, %v300_v48  ;;  %v460_v14 = vld [vmem:[%s816_s4 + $0x68] sm:$0xff]  ;;  %v336_v25 = vmul.f32 120.0, %v324_v6  ;;  %v343_v28 = vmul.f32 %v326_v7, %v326_v7 }
  0x90   :  { %469 = vmatpush.msra.mxu1 %v460_v14  ;;  %v364_v45 = vmul.f32 %v324_v6, %v629_v34  ;;  %v311_v48 = vmul.f32 120.0, %v304_v13 }
  0x91   :  { %v194_v26 = vmul.f32 %v676_v40, %v193_v17  ;;  %v305_v15 = vadd.f32 %v301_v2, %v298_v1  ;;  %v360_v17 = vmul.f32 %v320_v54, %v621_v29  ;;  %v309_v22 = vmul.f32 -12.0, %v301_v2 }
  0x92   :  { %v89_v35 = vpop.f32.mrf.mxu0  ;;  %470 = vmatpush.msra.mxu1 %v459_v24  ;;  %v342_v54 = vmul.f32 36.0, %v341_v27  ;;  %v365_v61 = vadd.f32 %v364_v45, %v635_v41 }
  0x93   :  { %v699_v39 = vadd.f32 %v194_v26, %v681_v55  ;;  %v90_v43 = vadd.f32 %v665_v20, %v89_v35  ;;  %v338_v26 = vmul.f32 %v337_v8, %v322_v57  ;;  %v306_v38 = vadd.f32 %v305_v15, %v304_v13  ;;  %v454_v13 = vld [vmem:[%s816_s4 + $0x38] sm:$0xff] }
  0x94   :  { %471 = vmatpush.msra.mxu1 %v458_v36  ;;  %v310_v47 = vadd.f32 %v309_v22, %v308_v16  ;;  %v350_v8 = vmul.f32 -12.0, %v342_v54  ;;  %v377_v14 = vmul.f32 120.0, %v365_v61  ;;  %v451_v36 = vld [vmem:[%s816_s4 + $0x20] sm:$0xff] }
  0x95   :  { %v232_v51 = vmul.f32 %v225_v18, %v699_v39  ;;  %v362_v18 = vmul.f32 %v322_v57, %v623_v30  ;;  %v339_v53 = vmul.f32 %v338_v26, %v336_v25  ;;  %v344_v57 = vmul.f32 0.1, %v343_v28 }
  0x96   :  { %v307_v1 = vadd.f32 0.3, %v306_v38  ;;  %v312_v2 = vadd.f32 %v311_v48, %v310_v47  ;;  %v405_v25 = vmul.f32 %v365_v61, %v629_v34  ;;  %v448_v61 = vld [vmem:[%s816_s4 + $0x8] sm:$0xff] }
  0x97   :  { %v233_v60 = vsub.f32 %v90_v43, %v232_v51  ;;  %v361_v43 = vadd.f32 %v360_v17, %v625_v32  ;;  %v363_v44 = vadd.f32 %v362_v18, %v627_v33  ;;  %v457_v51 = vld [vmem:[%s816_s4 + $0x50] sm:$0xff]  ;;  %v345_v5 = vmul.f32 %v344_v57, %v328_v52 }
  0x98   :  { %472 = vmatpush.msra.mxu1 %v457_v51  ;;  %v346_v6 = vadd.f32 %v342_v54, %v339_v53  ;;  %v313_v17 = vadd.f32 3.18, %v312_v2  ;;  %v406_v47 = vadd.f32 %v405_v25, %v635_v41 }
  0x99   :  { %v234_v3 = vadd.f32 %v233_v60, %v231_v49  ;;  %v366_v49 = vmul.f32 %v326_v7, %v631_v37  ;;  %v95_v60 = vpop.f32.mrf.mxu3  ;;  %v378_v62 = vmul.f32 %v363_v44, %v363_v44  ;;  %v381_v63 = vmul.f32 %v361_v43, %v361_v43 }
  0x9a   :  { %473 = vmatpush.msra.mxu1 %v456_v59  ;;  %v349_v7 = vmul.f32 115.0, %v339_v53  ;;  %v403_v12 = vmul.f32 %v363_v44, %v623_v30  ;;  %v347_v23 = vadd.f32 %v346_v6, %v345_v5  ;;  %v352_v24 = vmul.f32 120.0, %v345_v5  ;;  %v449_v53 = vld [vmem:[%s816_s4 + $0x10] sm:$0xff] }
  0x9b   :  { %v235_v10 = vmul.f32 %v676_v40, %v234_v3  ;;  %v367_v3 = vadd.f32 %v366_v49, %v637_v42  ;;  %v379_v15 = vmul.f32 %v378_v62, %v363_v44  ;;  %v382_v16 = vmul.f32 %v381_v63, %v381_v63 }
  0x9c   :  { %474 = vmatpush.msra.mxu1 %v455_v4  ;;  %v351_v30 = vadd.f32 %v350_v8, %v349_v7  ;;  %v404_v28 = vadd.f32 %v403_v12, %v627_v33  ;;  %v450_v33 = vld [vmem:[%s816_s4 + $0x18] sm:$0xff]  ;;  %v418_v63 = vmul.f32 120.0, %v406_v47  ;;  %v447_v4 = vld [vmem:[%s816_s4] sm:$0xff] }
  0x9d   :  { %v724_v19 = vadd.f32 %v235_v10, %v699_v39  ;;  %v96_v10 = vadd.f32 %v665_v20, %v95_v60  ;;  %v384_v22 = vmul.f32 %v367_v3, %v367_v3  ;;  %v380_v38 = vmul.f32 %v379_v15, %v377_v14 }
  0x9e   :  { %475 = vmatpush.msra.mxu1 %v454_v13  ;;  %v419_v51 = vmul.f32 %v404_v28, %v404_v28 }
  0x9f   :  { %v273_v35 = vmul.f32 %v266_v11, %v724_v19  ;;  %v401_v11 = vmul.f32 %v361_v43, %v621_v29  ;;  %v453_v29 = vld [vmem:[%s816_s4 + $0x30] sm:$0xff]  ;;  %v383_v43 = vmul.f32 36.0, %v382_v16  ;;  %v390_v60 = vmul.f32 115.0, %v380_v38 }
  0xa0   :  { %476 = vmatpush.msra.mxu1 %v453_v29 }
  0xa1   :  { %v274_v46 = vsub.f32 %v93_v21, %v273_v35  ;;  %v368_v21 = vmul.f32 %v328_v52, %v644_v50  ;;  %v402_v27 = vadd.f32 %v401_v11, %v625_v32  ;;  %v452_v35 = vld [vmem:[%s816_s4 + $0x28] sm:$0xff]  ;;  %v98_v44 = vpop.f32.mrf.mxu3  ;;  %v385_v32 = vmul.f32 0.1, %v384_v22 }
  0xa2   :  { %477 = vmatpush.msra.mxu1 %v452_v35  ;;  %v99_v54 = vadd.f32 %v665_v20, %v98_v44  ;;  %v387_v57 = vadd.f32 %v383_v43, %v380_v38  ;;  %v391_v41 = vmul.f32 -12.0, %v383_v43  ;;  %v502_v35 = vadd.f32 -2.0, %v681_v55 }
  0xa3   :  { %v275_v58 = vadd.f32 %v274_v46, %v272_v31  ;;  %v407_v31 = vmul.f32 %v367_v3, %v631_v37  ;;  %v369_v45 = vadd.f32 %v368_v21, %v649_v56  ;;  %v348_v37 = vadd.f32 0.3, %v347_v23 }
  0xa4   :  { %v353_v46 = vadd.f32 %v352_v24, %v351_v30  ;;  %478 = vmatpush.msra.mxu1 %v451_v36  ;;  %v422_v52 = vmul.f32 %v402_v27, %v402_v27  ;;  %v392_v7 = vadd.f32 %v391_v41, %v390_v60  ;;  %v506_v36 = vadd.f32 -2.0, %v724_v19 }
  0xa5   :  { %v276_v0 = vmul.f32 %v676_v40, %v275_v58  ;;  %v408_v49 = vadd.f32 %v407_v31, %v637_v42  ;;  %v386_v59 = vmul.f32 %v385_v32, %v369_v45  ;;  %v409_v62 = vmul.f32 %v369_v45, %v644_v50 }
  0xa6   :  { %479 = vmatpush.msra.mxu1 %v450_v33  ;;  %v354_v42 = vadd.f32 3.18, %v353_v46  ;;  %v423_v2 = vmul.f32 %v422_v52, %v422_v52  ;;  %vm166_vm3 = vcmp.gt.f32.partialorder %v502_v35, 0.0  ;;  %vm248_vm4 = vcmp.gt.f32.partialorder %v506_v36, 0.0 }
  0xa7   :  { %v753_v9 = vadd.f32 %v276_v0, %v724_v19  ;;  %v425_v3 = vmul.f32 %v408_v49, %v408_v49  ;;  %v388_v6 = vadd.f32 %v387_v57, %v386_v59  ;;  %v393_v8 = vmul.f32 120.0, %v386_v59 }
  0xa8   :  { %480 = vmatpush.msra.mxu1 %v449_v53  ;;  %v424_v13 = vmul.f32 36.0, %v423_v2  ;;  %v526_v46 = vmov 0.0  }
  0xa9   :  { %v314_v18 = vmul.f32 %v307_v1, %v753_v9  ;;  %v420_v1 = vmul.f32 %v419_v51, %v404_v28  ;;  %v101_v50 = vpop.f32.mrf.mxu3  ;;  %v426_v14 = vmul.f32 0.1, %v425_v3  ;;  %v389_v16 = vadd.f32 0.3, %v388_v6 }
  0xaa   :  { %481 = vmatpush.msra.mxu1 %v448_v61  ;;  %v432_v30 = vmul.f32 -12.0, %v424_v13  ;;  %v508_v32 = vadd.f32 -2.0, %v753_v9  ;;  %v503_v49 = vsel %vm166_vm3, 1.0, %v526_v46  ;;  %v507_v51 = vsel %vm248_vm4, 1.0, %v526_v46 }
  0xab   :  { %v315_v26 = vsub.f32 %v96_v10, %v314_v18  ;;  %v410_v10 = vadd.f32 %v409_v62, %v649_v56  ;;  %v421_v12 = vmul.f32 %v420_v1, %v418_v63  ;;  %v102_v18 = vadd.f32 %v665_v20, %v101_v50 }
  0xac   :  { %482 = vmatpush.msra.mxu1 %v447_v4  ;;  %v504_v56 = vadd.f32 -2.0, %v699_v39  ;;  %vm289_vm5 = vcmp.gt.f32.partialorder %v508_v32, 0.0  ;;  %v525_v4 = vld [vmem:[%s815_s5] ss:$0 sm:$0xff] }
  0xad   :  { %v316_v34 = vadd.f32 %v315_v26, %v313_v17  ;;  %v394_v17 = vadd.f32 %v393_v8, %v392_v7  ;;  %v431_v21 = vmul.f32 115.0, %v421_v12  ;;  %v427_v29 = vmul.f32 %v426_v14, %v410_v10 }
  0xae   :  { %v428_v23 = vadd.f32 %v424_v13, %v421_v12  ;;  %vm207_vm2 = vcmp.gt.f32.partialorder %v504_v56, 0.0  ;;  %v509_v57 = vsel %vm289_vm5, 1.0, %v526_v46 }
  0xaf   :  { %v317_v48 = vmul.f32 %v676_v40, %v316_v34  ;;  %v395_v24 = vadd.f32 3.18, %v394_v17  ;;  %v433_v28 = vadd.f32 %v432_v30, %v431_v21  ;;  %v434_v31 = vmul.f32 120.0, %v427_v29 }
  0xb0   :  { %v429_v27 = vadd.f32 %v428_v23, %v427_v29  ;;  %v505_v47 = vsel %vm207_vm2, 1.0, %v526_v46 }
  0xb1   :  { %v318_v58 = vadd.f32 %v317_v48, %v753_v9  ;;  %v104_v43 = vpop.f32.mrf.mxu3  ;;  %v435_v45 = vadd.f32 %v434_v31, %v433_v28  ;;  %v210_v53 = vadd.f32 %v505_v47, %v503_v49 }
  0xb2   :  { %v430_v44 = vadd.f32 0.3, %v429_v27  ;;  %v105_v39 = vadd.f32 %v665_v20, %v104_v43 }
  0xb3   :  { %v355_v0 = vmul.f32 %v348_v37, %v318_v58  ;;  %v510_v37 = vadd.f32 -2.0, %v318_v58  ;;  %v436_v55 = vadd.f32 3.18, %v435_v45  ;;  %v251_v59 = vadd.f32 %v507_v51, %v210_v53 }
  0xb5   :  { %v356_v5 = vsub.f32 %v99_v54, %v355_v0  ;;  %vm330_vm6 = vcmp.gt.f32.partialorder %v510_v37, 0.0  ;;  %v292_v20 = vadd.f32 %v509_v57, %v251_v59 }
  0xb6   :  { %v511_v60 = vsel %vm330_vm6, 1.0, %v526_v46 }
  0xb7   :  { %v357_v11 = vadd.f32 %v356_v5, %v354_v42  ;;  %v333_v61 = vadd.f32 %v511_v60, %v292_v20 }
  0xb9   :  { %v358_v15 = vmul.f32 %v676_v40, %v357_v11 }
  0xbb   :  { %v359_v22 = vadd.f32 %v358_v15, %v318_v58 }
  0xbd   :  { %v396_v25 = vmul.f32 %v389_v16, %v359_v22  ;;  %v512_v19 = vadd.f32 -2.0, %v359_v22 }
  0xbf   :  { %v397_v26 = vsub.f32 %v102_v18, %v396_v25  ;;  %vm371_vm7 = vcmp.gt.f32.partialorder %v512_v19, 0.0 }
  0xc0   :  { %v513_v41 = vsel %vm371_vm7, 1.0, %v526_v46 }
  0xc1   :  { %v398_v38 = vadd.f32 %v397_v26, %v395_v24  ;;  %v374_v63 = vadd.f32 %v513_v41, %v333_v61 }
  0xc3   :  { %v399_v34 = vmul.f32 %v676_v40, %v398_v38 }
  0xc5   :  { %v400_v33 = vadd.f32 %v399_v34, %v359_v22 }
  0xc7   :  { %v437_v48 = vmul.f32 %v430_v44, %v400_v33  ;;  %v514_v54 = vadd.f32 -2.0, %v400_v33 }
  0xc9   :  { %v438_v52 = vsub.f32 %v105_v39, %v437_v48  ;;  %vm412_vm8 = vcmp.gt.f32.partialorder %v514_v54, 0.0 }
  0xca   :  { %v515_v62 = vsel %vm412_vm8, 1.0, %v526_v46 }
  0xcb   :  { %v439_v9 = vadd.f32 %v438_v52, %v436_v55  ;;  %v415_v1 = vadd.f32 %v515_v62, %v374_v63 }
  0xcd   :  { %v440_v58 = vmul.f32 %v676_v40, %v439_v9 }
  0xcf   :  { %v441_v42 = vadd.f32 %v440_v58, %v400_v33 }
  0xd1   :  { %v516_v0 = vadd.f32 -2.0, %v441_v42 }
  0xd3   :  { %vm443_vm9 = vcmp.gt.f32.partialorder %v516_v0, 0.0 }
  0xd4   :  { %v517_v2 = vsel %vm443_vm9, 1.0, %v526_v46 }
  0xd5   :  { %v446_v3 = vadd.f32 %v517_v2, %v415_v1 }
  0xd7   :  { %483 = vmatmul.f32.vlgmr.msra.gmra.mxu1 %v446_v3 }
 0x154   :  { %v484_v5 = vpop.f32.mrf.mxu1 }
 0x155   :  { %v485_v6 = vadd.f32 %v525_v4, %v484_v5 }
 0x157   :  { %488 = vst.msk [vmem:[%s817_s6] sm:$0xff] %vm487_vm10, %v485_v6 }

</bundles_post_ra>
